<compile_context>
chip_gen: v5e
topology: v5e:2x2
jax: 0.10.0
libtpu: 0.0.40
codegen_flags: <defaults>
</compile_context>

<pallas_src>
import functools

import jax
import jax.numpy as jnp
from jax import lax
from jax.experimental import pallas as pl
from jax.experimental.pallas import tpu as pltpu


def _round_up(x, m):
    return (x + m - 1) // m * m


def normalize_kernel(means_ref, normed_ref):
    m = means_ref[...].astype(jnp.float32)                       # (C, Dp)
    g_mean = jnp.mean(m, axis=0, keepdims=True)                  # (1, Dp)
    centered = m - g_mean                                        # (C, Dp)
    sumsq = jnp.sum(centered * centered, axis=1, keepdims=True)  # (C, 1)
    # F.normalize: v / max(||v||, 1e-12)  ==  v * rsqrt(max(||v||^2, 1e-24))
    inv = lax.rsqrt(jnp.maximum(sumsq, 1e-24))                   # EUP, not a VPU divide
    normed_ref[...] = centered * inv


def cosine_rowmax_kernel(q_ref, k_ref, rowmax_ref, *, n_real, tm):
    i = pl.program_id(0)
    q = q_ref[...]                                               # (tm, Dp) f32
    k = k_ref[...]                                               # (Cp, Dp) f32
    cp = k.shape[0]
    # cosine = q @ k.T without materializing the transpose: contract dim 1 of both.
    # TODO(synk): on v6e/v7x a bf16 cast of q/k (keeping f32 accumulation) would
    # halve MXU input bandwidth; kept f32 to track the float32 PyTorch reference.
    cosine = lax.dot_general(q, k, (((1,), (1,)), ((), ())),
                             preferred_element_type=jnp.float32)  # (tm, Cp)
    # cosine - 2*diag(diag(cosine)) == flip sign on the diagonal.
    row_ids = i * tm + lax.broadcasted_iota(jnp.int32, (tm, 1), 0)  # (tm, 1)
    col_ids = lax.broadcasted_iota(jnp.int32, (1, cp), 1)           # (1, Cp)
    cos_mod = jnp.where(row_ids == col_ids, -cosine, cosine)
    if cp > n_real:  # static: mask padded (fake) key columns below any real cosine
        cos_mod = jnp.where(col_ids >= n_real, -2.0, cos_mod)
    row_max = jnp.max(cos_mod, axis=1, keepdims=True)             # (tm, 1)
    rowmax_ref[...] = jnp.clip(row_max, -0.99999, 0.99999)


def nc2_loss(means):
    """means: (C, D) float32.  Returns (loss, max_cosine) like NC2Loss.forward."""
    C, D = means.shape
    Dp = _round_up(D, 128)
    # Row-tile size: multiple of 8 sublanes, capped at 128 (works on v5e's 128^2
    # MXU tiles and keeps per-step VMEM small on v7x's 64 MiB).
    tm = min(_round_up(C, 8), 128)
    Cp = _round_up(C, tm)

    means_p = means if Dp == D else jnp.pad(means, ((0, 0), (0, Dp - D)))

    # Stage 1: center + L2-normalize rows (computed on the real C rows only).
    normed = pl.pallas_call(
        normalize_kernel,
        grid=(1,),
        out_shape=jax.ShapeDtypeStruct((C, Dp), jnp.float32),
        in_specs=[pl.BlockSpec((C, Dp), lambda i: (0, 0))],
        out_specs=pl.BlockSpec((C, Dp), lambda i: (0, 0)),
    )(means_p)

    if Cp != C:
        normed = jnp.pad(normed, ((0, Cp - C), (0, 0)))

    # Stage 2: cosine matrix one query-row block at a time, row-max in-kernel.
    # Bounds VMEM to ~tm*Cp + Cp*Dp instead of Cp*Cp and lets megacore shard rows.
    rowmax = pl.pallas_call(
        functools.partial(cosine_rowmax_kernel, n_real=C, tm=tm),
        grid=(Cp // tm,),
        out_shape=jax.ShapeDtypeStruct((Cp, 1), jnp.float32),
        in_specs=[
            pl.BlockSpec((tm, Dp), lambda i: (i, 0)),   # query row block
            pl.BlockSpec((Cp, Dp), lambda i: (0, 0)),   # full key matrix (resident)
        ],
        out_specs=pl.BlockSpec((tm, 1), lambda i: (i, 0)),
        compiler_params=pltpu.CompilerParams(
            dimension_semantics=("parallel",)),
    )(normed, normed)

    rowmax = rowmax[:C, 0]
    # clip is monotone, so max(clip(row_max)) == clip(max(cosine)).
    max_cosine = jnp.max(rowmax)
    # TODO(synk): acos has no guaranteed Mosaic lowering; arccos + mean over C
    # scalars stays as plain-JAX glue.
    loss = -jnp.mean(jnp.arccos(rowmax))
    return loss, max_cosine


def nc2_loss_ref(means):
    """Pure-JAX reference mirroring the PyTorch module."""
    g_mean = means.mean(axis=0)
    centered = means - g_mean
    norm = jnp.maximum(jnp.linalg.norm(centered, axis=1, keepdims=True), 1e-12)
    normed = centered / norm
    cosine = normed @ normed.T
    cosine = cosine - 2.0 * jnp.diag(jnp.diag(cosine))
    max_cosine = jnp.clip(jnp.max(cosine), -0.99999, 0.99999)
    loss = -jnp.mean(jnp.arccos(jnp.clip(jnp.max(cosine, axis=1),
                                         -0.99999, 0.99999)))
    return loss, max_cosine


if __name__ == "__main__":
    key = jax.random.PRNGKey(0)
    k1, k2 = jax.random.split(key)

    # Small shapes consistent with the module: 8 classes, 32-dim features.
    C, D = 8, 32
    means = jax.random.normal(k1, (C, D), dtype=jnp.float32)
    loss, max_cos = nc2_loss(means)
    jax.block_until_ready((loss, max_cos))
    loss_ref, max_cos_ref = nc2_loss_ref(means)
    assert jnp.allclose(loss, loss_ref, atol=1e-4), (loss, loss_ref)
    assert jnp.allclose(max_cos, max_cos_ref, atol=1e-4), (max_cos, max_cos_ref)

    # Also exercise the tiled path (multi-block grid, C and D padding + masking).
    C2, D2 = 200, 96
    means2 = jax.random.normal(k2, (C2, D2), dtype=jnp.float32)
    loss2, max_cos2 = nc2_loss(means2)
    jax.block_until_ready((loss2, max_cos2))
    loss2_ref, max_cos2_ref = nc2_loss_ref(means2)
    assert jnp.allclose(loss2, loss2_ref, atol=2e-4), (loss2, loss2_ref)
    assert jnp.allclose(max_cos2, max_cos2_ref, atol=2e-4), (max_cos2, max_cos2_ref)

    print("KERNEL_OK")
</pallas_src>

<mosaic_0001>
module attributes {stable_mosaic.version = 11 : i64} {
  func.func @normalize_kernel(%arg0: i32, %arg1: memref<8x128xf32, #tpu.memory_space<vmem>>, %arg2: memref<8x128xf32, #tpu.memory_space<vmem>>) attributes {dimension_semantics = [#tpu.dimension_semantics<arbitrary>], iteration_bounds = array<i64: 1>, scalar_prefetch = 0 : i64, scratch_operands = 0 : i64, tpu.core_type = #tpu.core_type<tc>, window_params = [{pipeline_mode = #tpu.pipeline_mode<synchronous>, transform_indices = @transform_0, window_bounds = array<i64: 8, 128>}, {pipeline_mode = #tpu.pipeline_mode<synchronous>, transform_indices = @transform_1, window_bounds = array<i64: 8, 128>}]} {
    %c0 = arith.constant 0 : index
    %c0_0 = arith.constant 0 : index
    %0 = vector.load %arg1[%c0, %c0_0] : memref<8x128xf32, #tpu.memory_space<vmem>>, vector<8x128xf32>
    %cst = arith.constant dense<0.000000e+00> : vector<128xf32>
    %1 = vector.multi_reduction <add>, %0, %cst [0] : vector<8x128xf32> to vector<128xf32>
    %2 = vector.shape_cast %1 : vector<128xf32> to vector<1x128xf32>
    %cst_1 = arith.constant 8.000000e+00 : f32
    %3 = vector.broadcast %cst_1 : f32 to vector<1x128xf32>
    %4 = arith.divf %2, %3 : vector<1x128xf32>
    %5 = vector.broadcast %4 : vector<1x128xf32> to vector<8x128xf32>
    %6 = arith.subf %0, %5 : vector<8x128xf32>
    %7 = arith.mulf %6, %6 : vector<8x128xf32>
    %cst_2 = arith.constant dense<0.000000e+00> : vector<8xf32>
    %8 = vector.multi_reduction <add>, %7, %cst_2 [1] : vector<8x128xf32> to vector<8xf32>
    %9 = vector.shape_cast %8 : vector<8xf32> to vector<8x1xf32>
    %cst_3 = arith.constant 1.000000e-24 : f32
    %10 = vector.broadcast %cst_3 : f32 to vector<8x1xf32>
    %11 = arith.maximumf %9, %10 : vector<8x1xf32>
    %12 = math.rsqrt %11 : vector<8x1xf32>
    %13 = vector.broadcast %12 : vector<8x1xf32> to vector<8x128xf32>
    %14 = arith.mulf %6, %13 : vector<8x128xf32>
    %c0_4 = arith.constant 0 : index
    %c0_5 = arith.constant 0 : index
    %15 = vector.load %arg2[%c0_4, %c0_5] : memref<8x128xf32, #tpu.memory_space<vmem>>, vector<8x128xf32>
    tpu.vector_store %arg2[%c0_4, %c0_5], %14 {strides = array<i32>} : memref<8x128xf32, #tpu.memory_space<vmem>>, vector<8x128xf32>,
    return
  }
  func.func @transform_0(%arg0: i32) -> (i32, i32) {
    %c0_i32 = arith.constant 0 : i32
    %c0_i32_0 = arith.constant 0 : i32
    %c0_i32_1 = arith.constant 0 : i32
    return %c0_i32, %c0_i32_0 : i32, i32
  }
  func.func @transform_1(%arg0: i32) -> (i32, i32) {
    %c0_i32 = arith.constant 0 : i32
    %c0_i32_0 = arith.constant 0 : i32
    %c0_i32_1 = arith.constant 0 : i32
    return %c0_i32, %c0_i32_0 : i32, i32
  }
}

</mosaic_0001>

<bundles_post_ra>
// kernel: tpu_custom_call.1
= control target key start
LH: loop header
LB: loop body
LE: loop exit
PB: predicated region body
PF: predicated region fallthrough
CT: control target
= control target key end

     0   :  { %6 = vsyncpa [#allocation3], 0  ;;  %s150_s0 = inlined_call_operand.hbm [shape: f32[8,128], index: 0, kind: input, shape index: {}]   ;;  %s151_s1 = inlined_call_operand.hbm [shape: f32[8,128], index: 1, kind: output, shape index: {}]  }
   0x1   :  { %7 = vsyncpa [#allocation4], 0  ;;  %s13_s8 = sshll.u32 %s150_s0, 4  ;;  %s131_s9 = smov [#allocation2]   ;;  %s14_s8 = int_to_ptr.hbm [resolvable:$true] %s13_s8 }
   0x2   :  { %s15_s10 = sshll.u32 %s131_s9, 4  ;;  %s16_s10 = int_to_ptr.vmem [resolvable:$true] %s15_s10 }
   0x3   :  { %18 = dma.hbm_to_vmem [thread:$0]  %s14_s8, 128, %s16_s10, [#allocation3]  }
   0x4   :  { %127 = dma.done.wait [#allocation3], 128  }
   0x5   :  { %128 = vsyncadd [#allocation3], 4294967168  ;;  %v132_v0 = vmov 8.0   ;;  %v23_v2 = vld [vmem:[#allocation2] sm:$0xff]  ;;  %s133_s0 = smov [#allocation5]   ;;  %s62_s14 = sshll.u32 %s151_s1, 4  ;;  %s63_s14 = int_to_ptr.hbm [resolvable:$true] %s62_s14 }
   0x6   :  { %75 = vrcp.f32 %v132_v0  ;;  %v24_v3 = vrot.slane %v23_v2, 4  ;;  %s60_s11 = sshll.u32 %s133_s0, 4  ;;  %s61_s11 = int_to_ptr.vmem [resolvable:$true] %s60_s11 }
   0x8   :  { %v25_v5 = vadd.f32 %v24_v3, %v23_v2 }
   0xa   :  { %v26_v7 = vrot.slane %v25_v5, 2 }
   0xc   :  { %v76_v1 = vpop.eup %75  ;;  %v27_v9 = vadd.f32 %v26_v7, %v25_v5 }
   0xd   :  { %v31_v4 = vmul.f32 8.0, %v76_v1  ;;  %vm35_vm0 = vweird.f32 %v76_v1 }
   0xe   :  { %v28_v11 = vrot.slane %v27_v9, 1 }
   0xf   :  { %v32_v6 = vsub.f32 1.0, %v31_v4 }
  0x10   :  { %v29_v13 = vadd.f32 %v28_v11, %v27_v9 }
  0x11   :  { %v33_v8 = vmul.f32 %v76_v1, %v32_v6 }
  0x13   :  { %v34_v10 = vadd.f32 %v76_v1, %v33_v8 }
  0x15   :  { %v36_v12 = vsel %vm35_vm0, %v76_v1, %v34_v10 }
  0x16   :  { %v37_v14 = vmul.f32 %v36_v12, %v29_v13 }
  0x18   :  { %v38_v15 = vsub.f32 %v23_v2, %v37_v14 }
  0x1a   :  { %v39_v16 = vmul.f32 %v38_v15, %v38_v15 }
  0x1c   :  { %40 = vadd.xlane.f32.xlu0 %v39_v16 }
  0x8f   :  { %v41_v17 = vpop.xlane.xlu0 %40 }
  0x90   :  { %v42_v18 = vmax.f32 %v41_v17, 1e-24 }
  0x92   :  { %77 = vrsqrt.f32 %v42_v18  ;;  %vm49_vm2 = vweird.f32 %v42_v18 }
  0x98   :  { %v78_v19 = vpop.eup %77 }
  0x99   :  { %v44_v20 = vmul.f32 %v78_v19, %v42_v18  ;;  %vm50_vm1 = vweird.f32 %v78_v19 }
  0x9a   :  { %vm51_vm3 = vmor %vm49_vm2, %vm50_vm1 }
  0x9b   :  { %v45_v21 = vmul.f32 %v78_v19, %v44_v20 }
  0x9d   :  { %v46_v22 = vmul.f32 0.5, %v45_v21 }
  0x9f   :  { %v47_v23 = vsub.f32 1.5, %v46_v22 }
  0xa1   :  { %v48_v24 = vmul.f32 %v78_v19, %v47_v23 }
  0xa3   :  { %v52_v25 = vsel %vm51_vm3, %v78_v19, %v48_v24 }
  0xa4   :  { %v53_v26 = vmul.f32 %v52_v25, %v38_v15 }
  0xa6   :  { %54 = vst [vmem:[#allocation5] sm:$0xff] %v53_v26 }
  0xa7   :  { %65 = dma.vmem_to_hbm [thread:$0]  %s61_s11, 128, %s63_s14, [#allocation4]  }
  0xa8   :  { %129 = dma.done.wait [#allocation4], 128  }
  0xa9   :  { %130 = vsyncadd [#allocation4], 4294967168 }
  0xaa   :  { %70 = vsyncpa [#allocation3], 1 }
  0xab   :  { %71 = vsyncpa [#allocation4], 1 }

</bundles_post_ra>
